<compile_context>
chip_gen: v7x
topology: tpu7x:2x2x1
jax: 0.10.0
libtpu: 0.0.40
codegen_flags: <defaults>
</compile_context>

<pallas_src>
import functools
import math

import jax
import jax.numpy as jnp
from jax.experimental import pallas as pl
from jax.experimental.pallas import tpu as pltpu

_LOG_2PI = math.log(2.0 * math.pi)
_LOG_2 = math.log(2.0)


def _policy_kernel(x_ref, w1_ref, b1_ref, w2_ref, b2_ref, wh_ref, bh_ref,
                   *rest, adim, stochastic):
    if stochastic:
        eps_ref, out_ref = rest
    else:
        (out_ref,) = rest

    # --- MLP trunk (two hidden layers, ReLU after every layer incl. last) ---
    x = x_ref[...].astype(jnp.bfloat16)
    h = jnp.dot(x, w1_ref[...], preferred_element_type=jnp.float32) + b1_ref[...]
    h = jnp.maximum(h, 0.0)
    h = jnp.dot(h.astype(jnp.bfloat16), w2_ref[...],
                preferred_element_type=jnp.float32) + b2_ref[...]
    h = jnp.maximum(h, 0.0)

    # --- fused heads: one matmul produces [mu | log_std] ---
    heads = jnp.dot(h.astype(jnp.bfloat16), wh_ref[...],
                    preferred_element_type=jnp.float32) + bh_ref[...]
    mu = heads[:, :adim]
    log_std = jnp.clip(heads[:, adim:], -10.0, 2.0)

    # One exp serves both std = sigmoid(ls) = 1/(1+e) and -log(std) = log1p(e).
    # clamp guarantees e in [exp(-2), exp(10)] -> no overflow, plain log1p is stable.
    e = jnp.exp(-log_std)
    neg_log_std = jnp.log1p(e)          # == softplus(-log_std) == -log(sigmoid(log_std))

    if stochastic:
        eps = eps_ref[...]
        std = pl.reciprocal(1.0 + e, approx=True)   # sigmoid(log_std), EUP approx recip
        pre = mu + std * eps
        quad = -0.5 * (eps * eps)       # == -0.5*((pre-mu)/std)^2 exactly
    else:
        pre = mu
        quad = 0.0                      # eps == 0

    # tanh squashing correction: 2*(log 2 - pre - softplus(-2*pre)), stable softplus.
    t = -2.0 * pre
    sp = jnp.maximum(t, 0.0) + jnp.log1p(jnp.exp(-jnp.abs(t)))
    corr = 2.0 * (_LOG_2 - pre - sp)

    logp_el = quad + neg_log_std - 0.5 * _LOG_2PI - corr
    logp = jnp.sum(logp_el, axis=-1, keepdims=True)

    # fused output block: [:, :adim] = pi, [:, adim] = logp
    out_ref[:, :adim] = jnp.tanh(pre)
    out_ref[:, adim:] = logp


def _round_up(x, m):
    return (x + m - 1) // m * m


@functools.partial(jax.jit, static_argnames=("deterministic", "block_b"))
def mlp_gaussian_policy(o, params, eps=None, deterministic=False, block_b=512):
    """Full policy forward in one Pallas kernel.

    o:      (B, odim) float32
    params: packed params (see pack_params): bf16 weights, f32 biases, fused head
    eps:    (B, adim) float32 standard-normal noise (required unless deterministic)
    returns (pi (B, adim), logp_pi (B,))
    """
    B, odim = o.shape
    h1 = params["w1"].shape[1]
    h2 = params["w2"].shape[1]
    adim = params["w_head"].shape[1] // 2
    stochastic = not deterministic

    # batch tile: multiple of 8 sublanes, capped so 2x-buffered tiles stay well under
    # the scoped VMEM limit on all generations (incl. v7x's 64 MiB part).
    tb = min(block_b, _round_up(B, 8))
    b_pad = _round_up(B, tb)
    o_p = o if b_pad == B else jnp.pad(o, ((0, b_pad - B), (0, 0)))

    inputs = [o_p, params["w1"], params["b1"], params["w2"], params["b2"],
              params["w_head"], params["b_head"]]

    def resident(shape):                 # weights/biases: same block every grid step
        return pl.BlockSpec(shape, lambda i: (0, 0))

    in_specs = [pl.BlockSpec((tb, odim), lambda i: (i, 0)),
                resident(params["w1"].shape), resident(params["b1"].shape),
                resident(params["w2"].shape), resident(params["b2"].shape),
                resident(params["w_head"].shape), resident(params["b_head"].shape)]

    if stochastic:
        if eps is None:
            raise ValueError("eps must be provided when deterministic=False")
        # TODO(synk): eps could be generated in-kernel via pltpu.stateful_normal to
        # drop this DMA; kept external so the kernel is bit-checkable vs. the reference.
        eps_p = eps if b_pad == B else jnp.pad(eps, ((0, b_pad - B), (0, 0)))
        inputs.append(eps_p)
        in_specs.append(pl.BlockSpec((tb, adim), lambda i: (i, 0)))

    out_w = adim + 1
    grid = (b_pad // tb,)

    flops = 2 * b_pad * (odim * h1 + h1 * h2 + h2 * 2 * adim)
    transcendentals = b_pad * adim * 4          # exp, log1p, tanh, softplus-exp
    bytes_accessed = int(sum(int(a.size) * a.dtype.itemsize for a in inputs)
                         + b_pad * out_w * 4)

    kernel = functools.partial(_policy_kernel, adim=adim, stochastic=stochastic)
    fused = pl.pallas_call(
        kernel,
        out_shape=jax.ShapeDtypeStruct((b_pad, out_w), jnp.float32),
        grid_spec=pltpu.PrefetchScalarGridSpec(
            num_scalar_prefetch=0,
            grid=grid,
            in_specs=in_specs,
            out_specs=pl.BlockSpec((tb, out_w), lambda i: (i, 0)),
        ),
        compiler_params=pltpu.CompilerParams(
            dimension_semantics=("parallel",)),
        cost_estimate=pl.CostEstimate(flops=flops,
                                      transcendentals=transcendentals,
                                      bytes_accessed=bytes_accessed),
    )(*inputs)

    pi = fused[:B, :adim]
    logp_pi = fused[:B, adim]
    return pi, logp_pi


def init_params(key, odim, adim, hdims):
    """Deterministic init mirroring nn.Linear default (uniform +-1/sqrt(fan_in)), f32."""
    ks = jax.random.split(key, 8)

    def lin(kw, kb, fan_in, fan_out):
        bound = 1.0 / jnp.sqrt(float(fan_in))
        w = jax.random.uniform(kw, (fan_in, fan_out), jnp.float32, -bound, bound)
        b = jax.random.uniform(kb, (1, fan_out), jnp.float32, -bound, bound)
        return w, b

    h1, h2 = hdims
    w1, b1 = lin(ks[0], ks[1], odim, h1)
    w2, b2 = lin(ks[2], ks[3], h1, h2)
    wmu, bmu = lin(ks[4], ks[5], h2, adim)
    wls, bls = lin(ks[6], ks[7], h2, adim)
    return dict(w1=w1, b1=b1, w2=w2, b2=b2, wmu=wmu, bmu=bmu, wls=wls, bls=bls)


def pack_params(p):
    """Fuse mu/log_std heads into a single matmul and cast weights to bf16.

    Biases stay f32 (added to the f32 MXU accumulator)."""
    return dict(
        w1=p["w1"].astype(jnp.bfloat16), b1=p["b1"],
        w2=p["w2"].astype(jnp.bfloat16), b2=p["b2"],
        w_head=jnp.concatenate([p["wmu"], p["wls"]], axis=1).astype(jnp.bfloat16),
        b_head=jnp.concatenate([p["bmu"], p["bls"]], axis=1),
    )


def _reference(o, p, eps=None):
    """Pure-JAX f32 reference of the PyTorch forward (eps=None => deterministic)."""
    h = jax.nn.relu(o @ p["w1"] + p["b1"])
    h = jax.nn.relu(h @ p["w2"] + p["b2"])
    mu = h @ p["wmu"] + p["bmu"]
    log_std = jnp.clip(h @ p["wls"] + p["bls"], -10.0, 2.0)
    std = jax.nn.sigmoid(log_std)
    pre = mu if eps is None else mu + std * eps
    logp = jnp.sum(-0.5 * ((pre - mu) / std) ** 2 - jnp.log(std)
                   - 0.5 * jnp.log(2.0 * jnp.pi), axis=-1)
    logp -= jnp.sum(2.0 * (jnp.log(2.0) - pre - jax.nn.softplus(-2.0 * pre)), axis=-1)
    return jnp.tanh(pre), logp


if __name__ == "__main__":
    odim, adim, hdims = 24, 8, (32, 32)
    B = 2

    key = jax.random.PRNGKey(0)
    k_param, k_obs, k_eps = jax.random.split(key, 3)
    params_f32 = init_params(k_param, odim, adim, hdims)
    params = pack_params(params_f32)
    o = jax.random.normal(k_obs, (B, odim), dtype=jnp.float32)
    eps = jax.random.normal(k_eps, (B, adim), dtype=jnp.float32)

    # stochastic (rsample) path
    pi, logp_pi = mlp_gaussian_policy(o, params, eps, deterministic=False)
    # deterministic path (no eps input at all)
    pi_d, logp_d = mlp_gaussian_policy(o, params, deterministic=True)
    jax.block_until_ready((pi, logp_pi, pi_d, logp_d))

    pi_ref, logp_ref = _reference(o, params_f32, eps)
    pi_dref, logp_dref = _reference(o, params_f32, None)

    assert pi.shape == (B, adim) and logp_pi.shape == (B,)
    assert pi_d.shape == (B, adim) and logp_d.shape == (B,)
    # tolerances account for bf16 matmul weights/activations (f32 accumulation)
    assert jnp.allclose(pi, pi_ref, atol=2e-2, rtol=2e-2)
    assert jnp.allclose(logp_pi, logp_ref, atol=5e-2, rtol=2e-2)
    assert jnp.allclose(pi_d, pi_dref, atol=2e-2, rtol=2e-2)
    assert jnp.allclose(logp_d, logp_dref, atol=5e-2, rtol=2e-2)

    print("KERNEL_OK")
</pallas_src>

<mosaic_0001>
module attributes {stable_mosaic.version = 11 : i64} {
  func.func @_policy_kernel(%arg0: i32, %arg1: memref<8x24xf32, #tpu.memory_space<vmem>>, %arg2: memref<24x32xbf16, #tpu.memory_space<vmem>>, %arg3: memref<1x32xf32, #tpu.memory_space<vmem>>, %arg4: memref<32x32xbf16, #tpu.memory_space<vmem>>, %arg5: memref<1x32xf32, #tpu.memory_space<vmem>>, %arg6: memref<32x16xbf16, #tpu.memory_space<vmem>>, %arg7: memref<1x16xf32, #tpu.memory_space<vmem>>, %arg8: memref<8x8xf32, #tpu.memory_space<vmem>>, %arg9: memref<8x9xf32, #tpu.memory_space<vmem>>) attributes {dimension_semantics = [#tpu.dimension_semantics<parallel>], iteration_bounds = array<i64: 1>, scalar_prefetch = 0 : i64, scratch_operands = 0 : i64, tpu.core_type = #tpu.core_type<tc>, window_params = [{transform_indices = @transform_0, window_bounds = array<i64: 8, 24>}, {pipeline_mode = #tpu.pipeline_mode<synchronous>, transform_indices = @transform_1, window_bounds = array<i64: 24, 32>}, {pipeline_mode = #tpu.pipeline_mode<synchronous>, transform_indices = @transform_2, window_bounds = array<i64: 1, 32>}, {pipeline_mode = #tpu.pipeline_mode<synchronous>, transform_indices = @transform_3, window_bounds = array<i64: 32, 32>}, {pipeline_mode = #tpu.pipeline_mode<synchronous>, transform_indices = @transform_4, window_bounds = array<i64: 1, 32>}, {pipeline_mode = #tpu.pipeline_mode<synchronous>, transform_indices = @transform_5, window_bounds = array<i64: 32, 16>}, {pipeline_mode = #tpu.pipeline_mode<synchronous>, transform_indices = @transform_6, window_bounds = array<i64: 1, 16>}, {transform_indices = @transform_7, window_bounds = array<i64: 8, 8>}, {transform_indices = @transform_8, window_bounds = array<i64: 8, 9>}]} {
    %c0 = arith.constant 0 : index
    %c0_0 = arith.constant 0 : index
    %0 = vector.load %arg1[%c0, %c0_0] : memref<8x24xf32, #tpu.memory_space<vmem>>, vector<8x24xf32>
    %1 = arith.truncf %0 : vector<8x24xf32> to vector<8x24xbf16>
    %c0_1 = arith.constant 0 : index
    %c0_2 = arith.constant 0 : index
    %2 = vector.load %arg2[%c0_1, %c0_2] : memref<24x32xbf16, #tpu.memory_space<vmem>>, vector<24x32xbf16>
    %cst = arith.constant dense<0.000000e+00> : vector<8x32xf32>
    %3 = tpu.matmul %1, %2, %cst {dimension_numbers = #tpu.dot_dimension_numbers<[1], [0], [0], [1], [0, 0, 1, 1], [], []>} : vector<8x24xbf16>, vector<24x32xbf16>, vector<8x32xf32> -> vector<8x32xf32>
    %c0_3 = arith.constant 0 : index
    %c0_4 = arith.constant 0 : index
    %4 = vector.load %arg3[%c0_3, %c0_4] : memref<1x32xf32, #tpu.memory_space<vmem>>, vector<1x32xf32>
    %5 = vector.broadcast %4 : vector<1x32xf32> to vector<8x32xf32>
    %6 = arith.addf %3, %5 : vector<8x32xf32>
    %cst_5 = arith.constant 0.000000e+00 : f32
    %7 = vector.broadcast %cst_5 : f32 to vector<8x32xf32>
    %8 = arith.maximumf %6, %7 : vector<8x32xf32>
    %9 = arith.truncf %8 : vector<8x32xf32> to vector<8x32xbf16>
    %c0_6 = arith.constant 0 : index
    %c0_7 = arith.constant 0 : index
    %10 = vector.load %arg4[%c0_6, %c0_7] : memref<32x32xbf16, #tpu.memory_space<vmem>>, vector<32x32xbf16>
    %cst_8 = arith.constant dense<0.000000e+00> : vector<8x32xf32>
    %11 = tpu.matmul %9, %10, %cst_8 {dimension_numbers = #tpu.dot_dimension_numbers<[1], [0], [0], [1], [0, 0, 1, 1], [], []>} : vector<8x32xbf16>, vector<32x32xbf16>, vector<8x32xf32> -> vector<8x32xf32>
    %c0_9 = arith.constant 0 : index
    %c0_10 = arith.constant 0 : index
    %12 = vector.load %arg5[%c0_9, %c0_10] : memref<1x32xf32, #tpu.memory_space<vmem>>, vector<1x32xf32>
    %13 = vector.broadcast %12 : vector<1x32xf32> to vector<8x32xf32>
    %14 = arith.addf %11, %13 : vector<8x32xf32>
    %cst_11 = arith.constant 0.000000e+00 : f32
    %15 = vector.broadcast %cst_11 : f32 to vector<8x32xf32>
    %16 = arith.maximumf %14, %15 : vector<8x32xf32>
    %17 = arith.truncf %16 : vector<8x32xf32> to vector<8x32xbf16>
    %c0_12 = arith.constant 0 : index
    %c0_13 = arith.constant 0 : index
    %18 = vector.load %arg6[%c0_12, %c0_13] : memref<32x16xbf16, #tpu.memory_space<vmem>>, vector<32x16xbf16>
    %cst_14 = arith.constant dense<0.000000e+00> : vector<8x16xf32>
    %19 = tpu.matmul %17, %18, %cst_14 {dimension_numbers = #tpu.dot_dimension_numbers<[1], [0], [0], [1], [0, 0, 1, 1], [], []>} : vector<8x32xbf16>, vector<32x16xbf16>, vector<8x16xf32> -> vector<8x16xf32>
    %c0_15 = arith.constant 0 : index
    %c0_16 = arith.constant 0 : index
    %20 = vector.load %arg7[%c0_15, %c0_16] : memref<1x16xf32, #tpu.memory_space<vmem>>, vector<1x16xf32>
    %21 = vector.broadcast %20 : vector<1x16xf32> to vector<8x16xf32>
    %22 = arith.addf %19, %21 : vector<8x16xf32>
    %23 = vector.extract_strided_slice %22 {offsets = [0, 0], sizes = [8, 8], strides = [1, 1]} : vector<8x16xf32> to vector<8x8xf32>
    %24 = vector.extract_strided_slice %22 {offsets = [0, 8], sizes = [8, 8], strides = [1, 1]} : vector<8x16xf32> to vector<8x8xf32>
    %cst_17 = arith.constant -1.000000e+01 : f32
    %cst_18 = arith.constant 2.000000e+00 : f32
    %25 = vector.broadcast %cst_17 : f32 to vector<8x8xf32>
    %26 = arith.maximumf %25, %24 : vector<8x8xf32>
    %27 = vector.broadcast %cst_18 : f32 to vector<8x8xf32>
    %28 = arith.minimumf %27, %26 : vector<8x8xf32>
    %cst_19 = arith.constant 0.000000e+00 : f32
    %29 = vector.broadcast %cst_19 : f32 to vector<8x8xf32>
    %30 = arith.subf %29, %28 : vector<8x8xf32>
    %31 = math.exp %30 : vector<8x8xf32>
    %32 = math.log1p %31 : vector<8x8xf32>
    %c0_20 = arith.constant 0 : index
    %c0_21 = arith.constant 0 : index
    %33 = vector.load %arg8[%c0_20, %c0_21] : memref<8x8xf32, #tpu.memory_space<vmem>>, vector<8x8xf32>
    %cst_22 = arith.constant 1.000000e+00 : f32
    %34 = vector.broadcast %cst_22 : f32 to vector<8x8xf32>
    %35 = arith.addf %34, %31 : vector<8x8xf32>
    %36 = tpu.reciprocal %35 {approx = true} : vector<8x8xf32> -> vector<8x8xf32>
    %37 = arith.mulf %36, %33 : vector<8x8xf32>
    %38 = arith.addf %23, %37 : vector<8x8xf32>
    %39 = arith.mulf %33, %33 : vector<8x8xf32>
    %cst_23 = arith.constant -5.000000e-01 : f32
    %40 = vector.broadcast %cst_23 : f32 to vector<8x8xf32>
    %41 = arith.mulf %40, %39 : vector<8x8xf32>
    %cst_24 = arith.constant -2.000000e+00 : f32
    %42 = vector.broadcast %cst_24 : f32 to vector<8x8xf32>
    %43 = arith.mulf %42, %38 : vector<8x8xf32>
    %cst_25 = arith.constant 0.000000e+00 : f32
    %44 = vector.broadcast %cst_25 : f32 to vector<8x8xf32>
    %45 = arith.maximumf %43, %44 : vector<8x8xf32>
    %46 = math.absf %43 : vector<8x8xf32>
    %cst_26 = arith.constant 0.000000e+00 : f32
    %47 = vector.broadcast %cst_26 : f32 to vector<8x8xf32>
    %48 = arith.subf %47, %46 : vector<8x8xf32>
    %49 = math.exp %48 : vector<8x8xf32>
    %50 = math.log1p %49 : vector<8x8xf32>
    %51 = arith.addf %45, %50 : vector<8x8xf32>
    %cst_27 = arith.constant 0.693147182 : f32
    %52 = vector.broadcast %cst_27 : f32 to vector<8x8xf32>
    %53 = arith.subf %52, %38 : vector<8x8xf32>
    %54 = arith.subf %53, %51 : vector<8x8xf32>
    %cst_28 = arith.constant 2.000000e+00 : f32
    %55 = vector.broadcast %cst_28 : f32 to vector<8x8xf32>
    %56 = arith.mulf %55, %54 : vector<8x8xf32>
    %57 = arith.addf %41, %32 : vector<8x8xf32>
    %cst_29 = arith.constant 0.918938517 : f32
    %58 = vector.broadcast %cst_29 : f32 to vector<8x8xf32>
    %59 = arith.subf %57, %58 : vector<8x8xf32>
    %60 = arith.subf %59, %56 : vector<8x8xf32>
    %cst_30 = arith.constant dense<0.000000e+00> : vector<8xf32>
    %61 = vector.multi_reduction <add>, %60, %cst_30 [1] : vector<8x8xf32> to vector<8xf32>
    %62 = vector.shape_cast %61 : vector<8xf32> to vector<8x1xf32>
    %63 = math.tanh %38 : vector<8x8xf32>
    %c0_31 = arith.constant 0 : index
    %c0_32 = arith.constant 0 : index
    %64 = vector.load %arg9[%c0_31, %c0_32] : memref<8x9xf32, #tpu.memory_space<vmem>>, vector<8x8xf32>
    tpu.vector_store %arg9[%c0_31, %c0_32], %63 {strides = array<i32>} : memref<8x9xf32, #tpu.memory_space<vmem>>, vector<8x8xf32>,
    %c0_33 = arith.constant 0 : index
    %c8 = arith.constant 8 : index
    %65 = vector.load %arg9[%c0_33, %c8] : memref<8x9xf32, #tpu.memory_space<vmem>>, vector<8x1xf32>
    tpu.vector_store %arg9[%c0_33, %c8], %62 {strides = array<i32>} : memref<8x9xf32, #tpu.memory_space<vmem>>, vector<8x1xf32>,
    return
  }
  func.func @transform_0(%arg0: i32) -> (i32, i32) {
    %c0_i32 = arith.constant 0 : i32
    %c0_i32_0 = arith.constant 0 : i32
    return %arg0, %c0_i32 : i32, i32
  }
  func.func @transform_1(%arg0: i32) -> (i32, i32) {
    %c0_i32 = arith.constant 0 : i32
    %c0_i32_0 = arith.constant 0 : i32
    %c0_i32_1 = arith.constant 0 : i32
    return %c0_i32, %c0_i32_0 : i32, i32
  }
  func.func @transform_2(%arg0: i32) -> (i32, i32) {
    %c0_i32 = arith.constant 0 : i32
    %c0_i32_0 = arith.constant 0 : i32
    %c0_i32_1 = arith.constant 0 : i32
    return %c0_i32, %c0_i32_0 : i32, i32
  }
  func.func @transform_3(%arg0: i32) -> (i32, i32) {
    %c0_i32 = arith.constant 0 : i32
    %c0_i32_0 = arith.constant 0 : i32
    %c0_i32_1 = arith.constant 0 : i32
    return %c0_i32, %c0_i32_0 : i32, i32
  }
  func.func @transform_4(%arg0: i32) -> (i32, i32) {
    %c0_i32 = arith.constant 0 : i32
    %c0_i32_0 = arith.constant 0 : i32
    %c0_i32_1 = arith.constant 0 : i32
    return %c0_i32, %c0_i32_0 : i32, i32
  }
  func.func @transform_5(%arg0: i32) -> (i32, i32) {
    %c0_i32 = arith.constant 0 : i32
    %c0_i32_0 = arith.constant 0 : i32
    %c0_i32_1 = arith.constant 0 : i32
    return %c0_i32, %c0_i32_0 : i32, i32
  }
  func.func @transform_6(%arg0: i32) -> (i32, i32) {
    %c0_i32 = arith.constant 0 : i32
    %c0_i32_0 = arith.constant 0 : i32
    %c0_i32_1 = arith.constant 0 : i32
    return %c0_i32, %c0_i32_0 : i32, i32
  }
  func.func @transform_7(%arg0: i32) -> (i32, i32) {
    %c0_i32 = arith.constant 0 : i32
    %c0_i32_0 = arith.constant 0 : i32
    return %arg0, %c0_i32 : i32, i32
  }
  func.func @transform_8(%arg0: i32) -> (i32, i32) {
    %c0_i32 = arith.constant 0 : i32
    %c0_i32_0 = arith.constant 0 : i32
    return %arg0, %c0_i32 : i32, i32
  }
}

</mosaic_0001>

<bundles_post_ra>
// kernel: mlp_gaussian_policy.1
= control target key start
LH: loop header
LB: loop body
LE: loop exit
PB: predicated region body
PF: predicated region fallthrough
CT: control target
= control target key end

     0   :  { %v371_v0 = vmov 0.0   ;;  %vm55_vm0 = vcmask 1043456   ;;  %vm372_vm1 = vmmov 0   ;;  %vm51_vm2 = vcmask 195584   ;;  %s463_s1 = inlined_call_operand.vmem [shape: bf16[24,32], index: 1, kind: input, shape index: {}]   ;;  %s464_s0 = inlined_call_operand.vmem [shape: f32[8,24], index: 0, kind: input, shape index: {}]   ;;  %s465_s3 = inlined_call_operand.vmem [shape: bf16[32,32], index: 3, kind: input, shape index: {}]   ;;  %s466_s5 = inlined_call_operand.vmem [shape: bf16[32,16], index: 5, kind: input, shape index: {}]   ;;  %s467_s2 = inlined_call_operand.vmem [shape: f32[1,32], index: 2, kind: input, shape index: {}]   ;;  %s468_s7 = inlined_call_operand.vmem [shape: f32[8,8], index: 7, kind: input, shape index: {}]   ;;  %s469_s4 = inlined_call_operand.vmem [shape: f32[1,32], index: 4, kind: input, shape index: {}]   ;;  %s470_s6 = inlined_call_operand.vmem [shape: f32[1,16], index: 6, kind: input, shape index: {}]   ;;  %s471_s8 = inlined_call_operand.vmem [shape: f32[8,9], index: 8, kind: output, shape index: {}]  }
   0x1   :  { %325 = vmatprep.subr.bf16.mxu0 %v371_v0  ;;  %v353_v1 = vld [vmem:[%s463_s1] sm:$0xff]   ;;  %329 = vmatprep.mubr.msk.bf16.mxu0 %vm372_vm1, %v371_v0  ;;  %v354_v2 = vld [vmem:[%s463_s1 + $0x8] ss:$0 sps:$4 sm:$0xff]   ;;  %vm124_vm3 = vcmask 261120   ;;  %vm291_vm5 = vcmask 64512   ;;  %vm297_vm7 = vcmask 72768  }
   0x2   :  { %333 = vmatprep.subr.bf16.mxu1 %v371_v0  ;;  %337 = vmatprep.mubr.msk.bf16.mxu1 %vm372_vm1, %v371_v0  ;;  %v30_v3 = vld [vmem:[%s464_s0] sm:$0xff]  ;;  %v57_v4 = vsel %vm55_vm0, %v354_v2, 0  ;;  %v356_v7 = vld [vmem:[%s465_s3 + $0x8] sm:$0xff]  }
   0x3   :  { %326 = vmatpush3.bf16.msra.mxu0 %v353_v1  ;;  %v31_v5 = vpack.c.bf16 %v30_v3, %v30_v3  ;;  %v355_v6 = vld [vmem:[%s465_s3] sm:$0xff]   ;;  %v358_v17 = vld [vmem:[%s466_s5 + $0x8] sm:$0xff]  }
   0x4   :  { %327 = vmatprep.subr.bf16.mxu0 %v371_v0  ;;  %334 = vmatpush3.bf16.msra.mxu1 %v355_v6  ;;  %v357_v8 = vld [vmem:[%s466_s5] sm:$0xff]  }
   0x5   :  { %335 = vmatprep.subr.bf16.mxu1 %v371_v0  ;;  %v303_v9 = vld [vmem:[%s467_s2] ss:$0 sm:$0xff]  ;;  %s373_s2 = smov 8  }
   0x6   :  { %v250_v18 = vld [vmem:[%s468_s7] sm:$0xff] }
   0x7   :  { %328 = vmatpush3.bf16.msra.mxu0 %v57_v4  ;;  %254 = vrot.lane.b32.xlu0 %v250_v18, %s373_s2  ;;  %v307_v19 = vld [vmem:[%s469_s4] ss:$0 sm:$0xff]  ;;  %s374_s4 = smov 120   ;;  %v263_v59 = vmul.f32 %v250_v18, %v250_v18 }
   0x8   :  { %341 = vmatprep.subr.bf16.mxu0 %v371_v0  ;;  %336 = vmatpush3.bf16.msra.mxu1 %v356_v7  ;;  %v311_v27 = vld [vmem:[%s470_s6] ss:$0 sm:$0xff] }
   0x9   :  { %v264_v63 = vmul.f32 -0.5, %v263_v59 }
   0xa   :  { %330 = vmatmul.mubr.msk.bf16.vlgmr.msra.gmra.mrb[0].mxu0 %vm51_vm2, %v31_v5 }
   0xb   :  { %345 = vmatprep.mubr.msk.bf16.mxu0 %vm372_vm1, %v371_v0  ;;  %342 = vmatpush3.bf16.msra.mxu0 %v357_v8 }
   0xc   :  { %343 = vmatprep.subr.bf16.mxu0 %v371_v0 }
   0xf   :  { %344 = vmatpush3.bf16.msra.mxu0 %v358_v17 }
  0x79   :  { %v255_v40 = vpop.permute.xlu0 %254 }
  0xdd   :  { %v93_v10 = vpop.f32.mrb[0].mxu0 }
  0xde   :  { %v94_v11 = vadd.f32 %v303_v9, %v93_v10  ;;  %v331_v12 = vpop.f32.mrb[1].mxu0 }
  0xdf   :  { %v96_v13 = vpop.f32.mrb[2].mxu0 }
  0xe0   :  { %v99_v14 = vmax.f32 %v94_v11, 0.0  ;;  %v332_v15 = vpop.f32.mrb[3].mxu0 }
  0xe2   :  { %v100_v16 = vpack.c.bf16 %v99_v14, %v99_v14 }
  0xe4   :  { %338 = vmatmul.mubr.msk.bf16.vlgmr.msra.gmra.mrb[0].mxu1 %vm124_vm3, %v100_v16 }
 0x1b7   :  { %v162_v20 = vpop.f32.mrb[0].mxu1 }
 0x1b8   :  { %v163_v21 = vadd.f32 %v307_v19, %v162_v20  ;;  %v339_v22 = vpop.f32.mrb[1].mxu1 }
 0x1b9   :  { %v165_v23 = vpop.f32.mrb[2].mxu1 }
 0x1ba   :  { %v168_v24 = vmax.f32 %v163_v21, 0.0  ;;  %v340_v25 = vpop.f32.mrb[3].mxu1 }
 0x1bc   :  { %v169_v26 = vpack.c.bf16 %v168_v24, %v168_v24 }
 0x1be   :  { %346 = vmatmul.mubr.msk.bf16.vlgmr.msra.gmra.mrb[4].mxu0 %vm124_vm3, %v169_v26 }
 0x291   :  { %v230_v28 = vpop.f32.mrb[4].mxu0 }
 0x292   :  { %v231_v29 = vadd.f32 %v311_v27, %v230_v28  ;;  %v347_v30 = vpop.f32.mrb[5].mxu0 }
 0x293   :  { %v233_v31 = vpop.f32.mrb[6].mxu0 }
 0x294   :  { %v236_v32 = vmax.f32 %v231_v29, -10.0  ;;  %v348_v33 = vpop.f32.mrb[7].mxu0 }
 0x296   :  { %v237_v34 = vmin.f32 %v236_v32, 2.0 }
 0x298   :  { %v238_v35 = vsub.f32 0.0, %v237_v34 }
 0x29a   :  { %v239_v36 = vmul.f32 1.442695, %v238_v35 }
 0x29c   :  { %359 = vpow2.f32 %v239_v36 }
 0x2a6   :  { %v360_v37 = vpop.eup %359 }
 0x2a7   :  { %v241_v38 = vadd.f32 1.0, %v360_v37  ;;  %v244_v39 = vmul.f32 -0.5, %v360_v37  ;;  %v247_v42 = vand.u32 2147483647, %v360_v37 }
 0x2a9   :  { %361 = vrcp.f32 %v241_v38  ;;  %v245_v41 = vadd.f32 1.0, %v244_v39  ;;  %vm248_vm4 = vcmp.lt.f32.partialorder %v247_v42, 0.0004427343 }
 0x2aa   :  { %363 = vlog2.f32 %v241_v38 }
 0x2ab   :  { %v246_v47 = vmul.f32 %v360_v37, %v245_v41 }
 0x2b3   :  { %v362_v43 = vpop.eup %361 }
 0x2b4   :  { %v364_v44 = vpop.eup %363  ;;  %v257_v45 = vmul.f32 %v362_v43, %v255_v40 }
 0x2b5   :  { %v243_v46 = vmul.f32 0.6931472, %v364_v44 }
 0x2b6   :  { %259 = vrot.lane.b32.xlu0 %v257_v45, %s374_s4 }
 0x2b7   :  { %v249_v48 = vsel %vm248_vm4, %v246_v47, %v243_v46 }
 0x2b8   :  { %285 = vrot.lane.b32.xlu1 %v249_v48, %s374_s4 }
 0x328   :  { %v260_v49 = vpop.permute.xlu0 %259 }
 0x329   :  { %v262_v50 = vadd.f32 %v260_v49, %v231_v29 }
 0x32a   :  { %v286_v0 = vpop.permute.xlu1 %285 }
 0x32b   :  { %v265_v51 = vmul.f32 -2.0, %v262_v50  ;;  %365 = vtanh.f32 %v262_v50  ;;  %v281_v5 = vsub.f32 0.6931472, %v262_v50  ;;  %v288_v6 = vadd.f32 %v286_v0, %v264_v63 }
 0x32d   :  { %v267_v52 = vand.u32 2147483647, %v265_v51  ;;  %v266_v3 = vmax.f32 %v265_v51, 0.0  ;;  %v315_v9 = vadd.f32 -0.9189385, %v288_v6 }
 0x32f   :  { %v268_v53 = vsub.f32 0.0, %v267_v52 }
 0x331   :  { %v269_v54 = vmul.f32 1.442695, %v268_v53 }
 0x333   :  { %367 = vpow2.f32 %v269_v54 }
 0x335   :  { %v366_v55 = vpop.eup %365 }
 0x336   :  { %296 = vst.msk [vmem:[%s471_s8] sm:$0xff] %vm291_vm5, %v366_v55 }
 0x33d   :  { %v368_v56 = vpop.eup %367 }
 0x33e   :  { %v271_v57 = vadd.f32 1.0, %v368_v56  ;;  %v274_v58 = vmul.f32 -0.5, %v368_v56  ;;  %v277_v61 = vand.u32 2147483647, %v368_v56 }
 0x340   :  { %369 = vlog2.f32 %v271_v57  ;;  %v275_v60 = vadd.f32 1.0, %v274_v58  ;;  %vm278_vm6 = vcmp.lt.f32.partialorder %v277_v61, 0.0004427343 }
 0x342   :  { %v276_v2 = vmul.f32 %v368_v56, %v275_v60 }
 0x34a   :  { %v370_v62 = vpop.eup %369 }
 0x34b   :  { %v273_v1 = vmul.f32 0.6931472, %v370_v62 }
 0x34d   :  { %v279_v4 = vsel %vm278_vm6, %v276_v2, %v273_v1 }
 0x34e   :  { %v280_v7 = vadd.f32 %v279_v4, %v266_v3 }
 0x350   :  { %v282_v8 = vsub.f32 %v281_v5, %v280_v7 }
 0x352   :  { %v283_v10 = vmul.f32 2.0, %v282_v8 }
 0x354   :  { %v290_v11 = vsub.f32 %v315_v9, %v283_v10 }
 0x356   :  { %v292_v12 = vsel %vm291_vm5, %v290_v11, 0.0 }
 0x357   :  { %293 = vadd.xlane.f32.xlu1 %v292_v12 }
 0x3e4   :  { %v294_v13 = vpop.xlane.xlu1 %293 }
 0x3e5   :  { %298 = vst.msk [vmem:[%s471_s8] sm:$0xff] %vm297_vm7, %v294_v13 }

</bundles_post_ra>
